<compile_context>
chip_gen: v7x
topology: tpu7x:2x2x1
jax: 0.10.0
libtpu: 0.0.40
codegen_flags: <defaults>
</compile_context>

<pallas_src>
import functools

import jax
import jax.numpy as jnp
from jax import lax
from jax.experimental import pallas as pl
from jax.experimental.pallas import tpu as pltpu


def _round_up(x: int, m: int) -> int:
    return (x + m - 1) // m * m


def _linear_kernel(x_ref, w_ref, b_ref, o_ref, acc_ref):
    """One (tm, tn) output tile of Q = obs @ W^T + b, accumulated over the K axis.

    x_ref:   (tm, tk)  obs tile
    w_ref:   (tn, tk)  weight tile in PyTorch nn.Linear layout (out, in) — no transpose
    b_ref:   (1,  tn)  bias tile
    o_ref:   (tm, tn)  Q-value tile (lane-dense, tn is a multiple of 128)
    acc_ref: (tm, tn)  f32 VMEM accumulator, persistent across the K grid axis
    """
    k = pl.program_id(2)

    @pl.when(k == 0)
    def _():
        acc_ref[...] = jnp.zeros_like(acc_ref)

    # Contract the feature axis of both operands (obs @ W^T) directly on the MXU;
    # either contraction orientation is fine, so no host-side weight.T is needed.
    acc_ref[...] += lax.dot_general(
        x_ref[...], w_ref[...],
        dimension_numbers=(((1,), (1,)), ((), ())),
        preferred_element_type=jnp.float32)

    @pl.when(k == pl.num_programs(2) - 1)
    def _():
        o_ref[...] = (acc_ref[...] + b_ref[...]).astype(o_ref.dtype)


def prepare_dqn_params(weight, bias):
    """Pad PyTorch-layout params ONCE so the kernel sees lane-dense (128-mult) dims.

    weight: [dim_out, dim_in]  ->  [round_up(dim_out,128), round_up(dim_in,128)]
    bias:   [dim_out]          ->  [1, round_up(dim_out,128)]
    Zero padding is exact: padded input features contribute 0, padded output
    columns are sliced away after the kernel.
    """
    dim_out, dim_in = weight.shape
    n_pad = _round_up(dim_out, 128)
    k_pad = _round_up(dim_in, 128)
    w_p = jnp.pad(weight, ((0, n_pad - dim_out), (0, k_pad - dim_in)))
    b_p = jnp.pad(bias, (0, n_pad - dim_out)).reshape(1, n_pad)
    return w_p, b_p


@functools.partial(jax.jit, static_argnames=("dim_out",))
def dqn_forward(obs, w_padded, b_padded, *, dim_out):
    """Forward pass of DQN: returns the Q-values tensor.

    obs:      [B, dim_in]           float32
    w_padded: [n_pad, k_pad]        PyTorch layout, padded by prepare_dqn_params
    b_padded: [1, n_pad]
    dim_out:  true (unpadded) number of actions
    """
    B, dim_in = obs.shape
    n_pad, k_pad = w_padded.shape

    # Tile selection: 256-wide N/K when divisible (fills v6e 256-wide MXU),
    # else 128 (v5e 128-wide MXU, still lane-dense). M rounds up to sublane
    # granularity and is capped at 256 to stay well inside v7x's 32 MiB scoped VMEM.
    tn = 256 if n_pad % 256 == 0 else 128
    tk = 256 if k_pad % 256 == 0 else 128
    m_base = _round_up(B, 8)
    tm = 256 if m_base >= 256 else m_base
    m_pad = _round_up(B, tm)

    x = obs
    if (m_pad, k_pad) != (B, dim_in):
        x = jnp.pad(obs, ((0, m_pad - B), (0, k_pad - dim_in)))

    grid = (m_pad // tm, n_pad // tn, k_pad // tk)

    cost = pl.CostEstimate(
        flops=2 * m_pad * k_pad * n_pad,
        transcendentals=0,
        bytes_accessed=4 * (m_pad * k_pad + n_pad * k_pad + n_pad + m_pad * n_pad),
    )

    q = pl.pallas_call(
        _linear_kernel,
        out_shape=jax.ShapeDtypeStruct((m_pad, n_pad), obs.dtype),
        grid=grid,
        in_specs=[
            pl.BlockSpec((tm, tk), lambda i, j, k: (i, k)),   # obs
            pl.BlockSpec((tn, tk), lambda i, j, k: (j, k)),   # weight (out, in)
            pl.BlockSpec((1, tn), lambda i, j, k: (0, j)),    # bias
        ],
        out_specs=pl.BlockSpec((tm, tn), lambda i, j, k: (i, j)),
        scratch_shapes=[pltpu.VMEM((tm, tn), jnp.float32)],
        compiler_params=pltpu.CompilerParams(
            dimension_semantics=("parallel", "parallel", "arbitrary")),
        cost_estimate=cost,
    )(x, w_padded, b_padded)

    if (m_pad, n_pad) != (B, dim_out):
        q = q[:B, :dim_out]

    # TODO(synk): TensorQValues is a torch.distributions.Distribution wrapper around
    # the Q-value logits; there is no Pallas/JAX distribution object to return here,
    # so we return the raw Q-values tensor (the wrapped data).
    return q


def init_dqn_params(key, dim_in, dim_out, dtype=jnp.float32):
    """Deterministic init mimicking torch.nn.Linear's default (uniform +/- 1/sqrt(dim_in))."""
    kw, kb = jax.random.split(key)
    bound = 1.0 / (dim_in ** 0.5)
    weight = jax.random.uniform(kw, (dim_out, dim_in), dtype, -bound, bound)
    bias = jax.random.uniform(kb, (dim_out,), dtype, -bound, bound)
    return weight, bias


if __name__ == "__main__":
    key = jax.random.PRNGKey(0)
    k_obs, k_params = jax.random.split(key)

    batch, dim_in, dim_out = 8, 32, 16
    obs = jax.random.normal(k_obs, (batch, dim_in), jnp.float32)
    weight, bias = init_dqn_params(k_params, dim_in, dim_out)

    # Pad params once (lane-dense layout), reuse for every forward.
    w_padded, b_padded = prepare_dqn_params(weight, bias)

    q_values = dqn_forward(obs, w_padded, b_padded, dim_out=dim_out)
    jax.block_until_ready(q_values)

    # sanity check against plain JAX reference
    q_ref = obs @ weight.T + bias
    assert q_values.shape == (batch, dim_out)
    assert jnp.allclose(q_values, q_ref, atol=1e-5, rtol=1e-5)

    print("KERNEL_OK")
</pallas_src>

<mosaic_0001>
module attributes {stable_mosaic.version = 11 : i64} {
  func.func @_linear_kernel(%arg0: i32, %arg1: i32, %arg2: i32, %arg3: memref<8x128xf32, #tpu.memory_space<vmem>>, %arg4: memref<128x128xf32, #tpu.memory_space<vmem>>, %arg5: memref<1x128xf32, #tpu.memory_space<vmem>>, %arg6: memref<8x128xf32, #tpu.memory_space<vmem>>, %arg7: memref<8x128xf32, #tpu.memory_space<vmem>>) attributes {dimension_semantics = [#tpu.dimension_semantics<parallel>, #tpu.dimension_semantics<parallel>, #tpu.dimension_semantics<arbitrary>], iteration_bounds = array<i64: 1, 1, 1>, scalar_prefetch = 0 : i64, scratch_operands = 1 : i64, tpu.core_type = #tpu.core_type<tc>, window_params = [{transform_indices = @transform_0, window_bounds = array<i64: 8, 128>}, {transform_indices = @transform_1, window_bounds = array<i64: 128, 128>}, {transform_indices = @transform_2, window_bounds = array<i64: 1, 128>}, {transform_indices = @transform_3, window_bounds = array<i64: 8, 128>}]} {
    %c0_i32 = arith.constant 0 : i32
    %0 = arith.cmpi eq, %arg2, %c0_i32 : i32
    %1 = arith.extui %0 : i1 to i32
    %c0_i32_0 = arith.constant 0 : i32
    %2 = arith.cmpi ne, %1, %c0_i32_0 : i32
    scf.if %2 {
      %cst_10 = arith.constant 0.000000e+00 : f32
      %12 = vector.broadcast %cst_10 : f32 to vector<8x128xf32>
      %c0_11 = arith.constant 0 : index
      %c0_12 = arith.constant 0 : index
      %13 = vector.load %arg7[%c0_11, %c0_12] : memref<8x128xf32, #tpu.memory_space<vmem>>, vector<8x128xf32>
      tpu.vector_store %arg7[%c0_11, %c0_12], %12 {strides = array<i32>} : memref<8x128xf32, #tpu.memory_space<vmem>>, vector<8x128xf32>,
    } else {
    }
    %c0 = arith.constant 0 : index
    %c0_1 = arith.constant 0 : index
    %3 = vector.load %arg7[%c0, %c0_1] : memref<8x128xf32, #tpu.memory_space<vmem>>, vector<8x128xf32>
    %c0_2 = arith.constant 0 : index
    %c0_3 = arith.constant 0 : index
    %4 = vector.load %arg3[%c0_2, %c0_3] : memref<8x128xf32, #tpu.memory_space<vmem>>, vector<8x128xf32>
    %c0_4 = arith.constant 0 : index
    %c0_5 = arith.constant 0 : index
    %5 = vector.load %arg4[%c0_4, %c0_5] : memref<128x128xf32, #tpu.memory_space<vmem>>, vector<128x128xf32>
    %cst = arith.constant dense<0.000000e+00> : vector<8x128xf32>
    %6 = tpu.matmul %4, %5, %cst {dimension_numbers = #tpu.dot_dimension_numbers<[1], [1], [0], [0], [0, 0, 1, 0], [], []>} : vector<8x128xf32>, vector<128x128xf32>, vector<8x128xf32> -> vector<8x128xf32>
    %7 = arith.addf %3, %6 : vector<8x128xf32>
    %c0_6 = arith.constant 0 : index
    %c0_7 = arith.constant 0 : index
    %8 = vector.load %arg7[%c0_6, %c0_7] : memref<8x128xf32, #tpu.memory_space<vmem>>, vector<8x128xf32>
    tpu.vector_store %arg7[%c0_6, %c0_7], %7 {strides = array<i32>} : memref<8x128xf32, #tpu.memory_space<vmem>>, vector<8x128xf32>,
    %c0_i32_8 = arith.constant 0 : i32
    %9 = arith.cmpi eq, %arg2, %c0_i32_8 : i32
    %10 = arith.extui %9 : i1 to i32
    %c0_i32_9 = arith.constant 0 : i32
    %11 = arith.cmpi ne, %10, %c0_i32_9 : i32
    scf.if %11 {
      %c0_10 = arith.constant 0 : index
      %c0_11 = arith.constant 0 : index
      %12 = vector.load %arg7[%c0_10, %c0_11] : memref<8x128xf32, #tpu.memory_space<vmem>>, vector<8x128xf32>
      %c0_12 = arith.constant 0 : index
      %c0_13 = arith.constant 0 : index
      %13 = vector.load %arg5[%c0_12, %c0_13] : memref<1x128xf32, #tpu.memory_space<vmem>>, vector<1x128xf32>
      %14 = vector.broadcast %13 : vector<1x128xf32> to vector<8x128xf32>
      %15 = arith.addf %12, %14 : vector<8x128xf32>
      %c0_14 = arith.constant 0 : index
      %c0_15 = arith.constant 0 : index
      %16 = vector.load %arg6[%c0_14, %c0_15] : memref<8x128xf32, #tpu.memory_space<vmem>>, vector<8x128xf32>
      tpu.vector_store %arg6[%c0_14, %c0_15], %15 {strides = array<i32>} : memref<8x128xf32, #tpu.memory_space<vmem>>, vector<8x128xf32>,
    } else {
    }
    return
  }
  func.func @transform_0(%arg0: i32, %arg1: i32, %arg2: i32) -> (i32, i32) {
    %c0_i32 = arith.constant 0 : i32
    return %arg0, %arg2 : i32, i32
  }
  func.func @transform_1(%arg0: i32, %arg1: i32, %arg2: i32) -> (i32, i32) {
    %c0_i32 = arith.constant 0 : i32
    return %arg1, %arg2 : i32, i32
  }
  func.func @transform_2(%arg0: i32, %arg1: i32, %arg2: i32) -> (i32, i32) {
    %c0_i32 = arith.constant 0 : i32
    %c0_i32_0 = arith.constant 0 : i32
    return %c0_i32, %arg1 : i32, i32
  }
  func.func @transform_3(%arg0: i32, %arg1: i32, %arg2: i32) -> (i32, i32) {
    %c0_i32 = arith.constant 0 : i32
    return %arg0, %arg1 : i32, i32
  }
}

</mosaic_0001>

<bundles_post_ra>
// kernel: dqn_forward.1
= control target key start
LH: loop header
LB: loop body
LE: loop exit
PB: predicated region body
PF: predicated region fallthrough
CT: control target
= control target key end

     0   :  { %8 = vsyncpa [#allocation4], 0  ;;  %s341_s0 = inlined_call_operand.vmem [shape: f32[8,128], index: 0, kind: input, shape index: {}]   ;;  %s342_s1 = inlined_call_operand.hbm [shape: f32[128,128], index: 1, kind: input, shape index: {}]   ;;  %s343_s2 = inlined_call_operand.vmem [shape: f32[1,128], index: 2, kind: input, shape index: {}]   ;;  %s344_s3 = inlined_call_operand.hbm [shape: f32[8,128], index: 3, kind: output, shape index: {}]  }
   0x1   :  { %9 = vsyncpa [#allocation5], 0  ;;  %s284_s12 = smov [#allocation3]   ;;  %s236_s16 = scalar_lea.hbm %s342_s1, 2048 }
   0x2   :  { %s17_s13 = sshll.u32 %s284_s12, 4  ;;  %p237_p0 = scmp.ne.s32.totalorder %s342_s1, %s236_s16  ;;  %s18_s13 = int_to_ptr.vmem [resolvable:$true] %s17_s13 }
   0x3   :  { %p240_p1 = scmp.lt.u32.totalorder %s236_s16, %s342_s1 }
   0x5   :  { %p242_p2 = pnand %p240_p1, %p237_p0 }
   0x7   :  { %245 = shalt.err (!%p242_p2)
}
   0x8   :  { %s246_s21 = scalar_lea.vmem %s18_s13, 2048  ;;  %p251_p4 = scmp.lt.s32.totalorder %s18_s13, %s18_s13 }
   0x9   :  { %p247_p3 = scmp.ne.s32.totalorder %s18_s13, %s246_s21  ;;  %p252_p5 = scmp.lt.s32.totalorder %s246_s21, %s246_s21 }
   0xb   :  { %p253_p6 = por %p252_p5, %p251_p4 }
   0xd   :  { %p254_p7 = pnand %p253_p6, %p247_p3 }
   0xf   :  { %257 = shalt.err (!%p254_p7)
}
  0x10   :  { %s285_s22 = smov 128   ;;  %s286_s23 = smov 8  }
  0x11   :  { %23 = dma.hbm_to_vmem [thread:$0]  %s342_s1, 2048, %s18_s13, [#allocation4], %s285_s22, %s285_s22, %s286_s23  }
  0x12   :  { %280 = dma.done.wait [#allocation4], 2048  }
  0x13   :  { %281 = vsyncadd [#allocation4], 4294965248  ;;  %v287_v0 = vmov 0.0|0.0   ;;  %vm288_vm0 = vmmov 0   ;;  %v289_v1 = vmov 0.0   ;;  %v36_v2 = vld [vmem:[#allocation3] sm:$0xff] }
  0x14   :  { %205 = vmatprep.subr.bf16.mxu0 %v287_v0  ;;  %202 = vmatprep.mubr.msk.f32.mxu0 %vm288_vm0, %v289_v1  ;;  %v37_v3 = vld [vmem:[#allocation3 + $0x8] sm:$0xff]  ;;  %v38_v5 = vld [vmem:[#allocation3 + $0x10] sm:$0xff]  ;;  %v39_v6 = vld [vmem:[#allocation3 + $0x18] sm:$0xff]  ;;  %s290_s29 = smov [#allocation6]  }
  0x15   :  { %v206_v4 = vpack.c.bf16 %v37_v3, %v36_v2  ;;  %v209_v7 = vpack.c.bf16 %v39_v6, %v38_v5  ;;  %v40_v8 = vld [vmem:[#allocation3 + $0x20] sm:$0xff]  ;;  %v41_v9 = vld [vmem:[#allocation3 + $0x28] sm:$0xff]  ;;  %v42_v11 = vld [vmem:[#allocation3 + $0x30] sm:$0xff]  ;;  %s143_s30 = sshll.u32 %s290_s29, 4  ;;  %s144_s30 = int_to_ptr.vmem [resolvable:$true] %s143_s30 }
  0x16   :  { %v212_v10 = vpack.c.bf16 %v41_v9, %v40_v8  ;;  %v43_v12 = vld [vmem:[#allocation3 + $0x38] sm:$0xff]  ;;  %v44_v14 = vld [vmem:[#allocation3 + $0x40] sm:$0xff]  ;;  %v45_v15 = vld [vmem:[#allocation3 + $0x48] sm:$0xff]  ;;  %s258_s4 = scalar_lea.vmem %s144_s30, 128  ;;  %p263_p9 = scmp.lt.s32.totalorder %s144_s30, %s144_s30 }
  0x17   :  { %207 = vmatpush3.bf16.xpose.msra.mxu0 %v206_v4  ;;  %v215_v13 = vpack.c.bf16 %v43_v12, %v42_v11  ;;  %v218_v16 = vpack.c.bf16 %v45_v15, %v44_v14  ;;  %v46_v17 = vld [vmem:[#allocation3 + $0x50] sm:$0xff]  ;;  %v47_v18 = vld [vmem:[#allocation3 + $0x58] sm:$0xff]  ;;  %v48_v20 = vld [vmem:[#allocation3 + $0x60] sm:$0xff]  ;;  %p259_p8 = scmp.ne.s32.totalorder %s144_s30, %s258_s4  ;;  %p264_p10 = scmp.lt.s32.totalorder %s258_s4, %s258_s4 }
  0x18   :  { %208 = vmatprep.subr.bf16.mxu0 %v287_v0  ;;  %v221_v19 = vpack.c.bf16 %v47_v18, %v46_v17  ;;  %v49_v21 = vld [vmem:[#allocation3 + $0x68] sm:$0xff]  ;;  %v50_v23 = vld [vmem:[#allocation3 + $0x70] sm:$0xff]  ;;  %v51_v24 = vld [vmem:[#allocation3 + $0x78] sm:$0xff] }
  0x19   :  { %v224_v22 = vpack.c.bf16 %v49_v21, %v48_v20  ;;  %v227_v25 = vpack.c.bf16 %v51_v24, %v50_v23  ;;  %v35_v26 = vld [vmem:[%s341_s0] sm:$0xff]  ;;  %p265_p11 = por %p264_p10, %p263_p9 }
  0x1a   :  { %v152_v27 = vld [vmem:[%s343_s2] ss:$0 sm:$0xff] }
  0x1b   :  { %p266_p12 = pnand %p265_p11, %p259_p8 }
  0x1f   :  { %210 = vmatpush3.bf16.xpose.msra.mxu0 %v209_v7 }
  0x20   :  { %211 = vmatprep.subr.bf16.mxu0 %v287_v0 }
  0x27   :  { %213 = vmatpush3.bf16.xpose.msra.mxu0 %v212_v10 }
  0x28   :  { %214 = vmatprep.subr.bf16.mxu0 %v287_v0 }
  0x2f   :  { %216 = vmatpush3.bf16.xpose.msra.mxu0 %v215_v13 }
  0x30   :  { %217 = vmatprep.subr.bf16.mxu0 %v287_v0 }
  0x37   :  { %219 = vmatpush3.bf16.xpose.msra.mxu0 %v218_v16 }
  0x38   :  { %220 = vmatprep.subr.bf16.mxu0 %v287_v0 }
  0x3f   :  { %222 = vmatpush3.bf16.xpose.msra.mxu0 %v221_v19 }
  0x40   :  { %223 = vmatprep.subr.bf16.mxu0 %v287_v0 }
  0x47   :  { %225 = vmatpush3.bf16.xpose.msra.mxu0 %v224_v22 }
  0x48   :  { %226 = vmatprep.subr.bf16.mxu0 %v287_v0 }
  0x4f   :  { %228 = vmatpush3.bf16.xpose.msra.mxu0 %v227_v25 }
  0x56   :  { %203 = vmatmul.mubr.f32.vlgmr.msra.gmra.mrb[0].mxu0 %v35_v26 }
 0x129   :  { %v118_v28 = vpop.f32.mrb[0].mxu0 }
 0x12a   :  { %v135_v29 = vadd.f32 %v152_v27, %v118_v28  ;;  %v204_v30 = vpop.f32.mrb[1].mxu0 }
 0x12c   :  { %136 = vst [vmem:[#allocation6] sm:$0xff] %v135_v29 }
 0x12d   :  { %269 = shalt.err (!%p266_p12)
}
 0x12e   :  { %s270_s6 = scalar_lea.hbm %s344_s3, 128 }
 0x12f   :  { %p271_p13 = scmp.ne.s32.totalorder %s344_s3, %s270_s6  ;;  %p274_p0 = scmp.lt.u32.totalorder %s270_s6, %s344_s3 }
 0x131   :  { %p276_p1 = pnand %p274_p0, %p271_p13 }
 0x133   :  { %279 = shalt.err (!%p276_p1)
}
 0x134   :  { %146 = dma.vmem_to_hbm [thread:$0]  %s144_s30, 128, %s344_s3, [#allocation5]  }
 0x135   :  { %282 = dma.done.wait [#allocation5], 128  }
 0x136   :  { %283 = vsyncadd [#allocation5], 4294967168 }
 0x137   :  { %150 = vsyncpa [#allocation4], 1 }
 0x138   :  { %151 = vsyncpa [#allocation5], 1 }

</bundles_post_ra>
